<compile_context>
chip_gen: v7x
topology: tpu7x:2x2x1
jax: 0.10.0
libtpu: 0.0.40
codegen_flags: <defaults>
</compile_context>

<pallas_src>
import functools

import jax
import jax.numpy as jnp
from jax.experimental import pallas as pl
from jax.experimental.pallas import tpu as pltpu


# ---------------------------------------------------------------------------
# Pallas kernel: one (n, t_out) output plane per (parallel) grid point, temporal
# taps on the trailing reduction axis.  Fuses GEMM + BN bias + ReLU + MaxPool.
# ---------------------------------------------------------------------------
def _stem_conv_bn_relu_pool_kernel(x_ref, w_ref, b_ref, o_ref, acc_ref, pad_ref,
                                   *, Ho, Wo, Hp, Wp):
    # x_ref  : (Ho*Wo, kH*kW*Cin)      bf16  spatial im2col of padded frame t*sT+j
    # w_ref  : (kH*kW*Cin, Cout)       bf16  temporal tap j, BN scale folded in
    # b_ref  : (1, Cout)               f32   folded BN bias
    # o_ref  : (Hp, Wp, Cout)          f32   pooled output plane
    # acc_ref: (Ho*Wo, Cout)           f32   conv accumulator (VMEM scratch)
    # pad_ref: (Ho+2, Wo+2, Cout)      f32   zero-padded plane for the 3x3 pool
    j = pl.program_id(2)

    @pl.when(j == 0)
    def _init():
        acc_ref[...] = jnp.zeros_like(acc_ref)

    acc_ref[...] += jnp.dot(x_ref[...], w_ref[...],
                            preferred_element_type=jnp.float32)

    @pl.when(j == pl.num_programs(2) - 1)
    def _epilogue():
        # Folded-BN bias + ReLU (scale already folded into the weights).
        y = jnp.maximum(acc_ref[...] + b_ref[...], 0.0)          # (Ho*Wo, Cout)
        # MaxPool3d([1,3,3], stride [1,2,2], pad [0,1,1]) fused here so the conv
        # map never hits HBM.  Post-ReLU values are >= 0, so zero padding is
        # equivalent to PyTorch's -inf padding.
        pad_ref[...] = jnp.zeros_like(pad_ref)
        pad_ref[1:Ho + 1, 1:Wo + 1, :] = y.reshape(Ho, Wo, y.shape[-1])
        pooled = pad_ref[pl.ds(0, Hp, 2), pl.ds(0, Wp, 2), :]
        for dh in range(3):
            for dw in range(3):
                if dh == 0 and dw == 0:
                    continue
                pooled = jnp.maximum(
                    pooled, pad_ref[pl.ds(dh, Hp, 2), pl.ds(dw, Wp, 2), :])
        o_ref[...] = pooled.astype(o_ref.dtype)


# ---------------------------------------------------------------------------
# One stem pathway: Conv3d + BN(eval) + ReLU + MaxPool, Pallas-backed.
# ---------------------------------------------------------------------------
def stem_pathway_forward(x, conv_w, bn, *, kernel, stride, padding, eps=1e-5):
    kT, kH, kW = kernel
    sT, sH, sW = stride
    pT, pH, pW = padding
    N, Cin, T, H, W = x.shape
    Cout = conv_w.shape[0]

    Tp = T + 2 * pT
    To = (Tp - kT) // sT + 1
    Ho = (H + 2 * pH - kH) // sH + 1
    Wo = (W + 2 * pW - kW) // sW + 1
    Hp = (Ho - 1) // 2 + 1
    Wp = (Wo - 1) // 2 + 1
    Ks = kH * kW * Cin

    # Fold eval-mode BN: scale into the conv weights, keep only the bias.
    gamma, beta, mean, var = bn
    scale = gamma / jnp.sqrt(var + eps)
    bias = (beta - mean * scale).reshape(1, Cout).astype(jnp.float32)

    wk = jnp.transpose(conv_w, (2, 3, 4, 1, 0)) * scale       # (kT,kH,kW,Cin,Cout)
    wk = wk.reshape(kT, Ks, Cout).astype(jnp.bfloat16)

    # Channels-last, zero-padded, bf16 activations.
    xt = jnp.transpose(x, (0, 2, 3, 4, 1)).astype(jnp.bfloat16)
    xp = jnp.pad(xt, ((0, 0), (pT, pT), (pH, pH), (pW, pW), (0, 0)))

    # Spatial-only im2col, kept per *padded* frame: the temporal taps become a
    # reduction grid axis with shifted-frame index maps (no kT-fold duplication).
    # TODO(synk): fuse this spatial patch extraction into the kernel too.
    wins = []
    for kh in range(kH):
        for kw in range(kW):
            wins.append(xp[:, :,
                           kh:kh + (Ho - 1) * sH + 1:sH,
                           kw:kw + (Wo - 1) * sW + 1:sW, :])
    patches = jnp.stack(wins, axis=4)                      # (N,Tp,Ho,Wo,kH*kW,Cin)
    patches = patches.reshape(N, Tp, Ho * Wo, Ks)          # K order = (kh,kw,ci)

    kernel_fn = functools.partial(
        _stem_conv_bn_relu_pool_kernel, Ho=Ho, Wo=Wo, Hp=Hp, Wp=Wp)

    out = pl.pallas_call(
        kernel_fn,
        out_shape=jax.ShapeDtypeStruct((N, To, Hp, Wp, Cout), jnp.float32),
        grid_spec=pltpu.PrefetchScalarGridSpec(
            num_scalar_prefetch=0,
            grid=(N, To, kT),
            in_specs=[
                # shifted padded frame t*sT + j for temporal tap j
                pl.BlockSpec((None, None, Ho * Wo, Ks),
                             lambda n, t, j: (n, t * sT + j, 0, 0)),
                pl.BlockSpec((None, Ks, Cout), lambda n, t, j: (j, 0, 0)),
                pl.BlockSpec((1, Cout), lambda n, t, j: (0, 0)),
            ],
            out_specs=pl.BlockSpec((None, None, Hp, Wp, Cout),
                                   lambda n, t, j: (n, t, 0, 0, 0)),
            scratch_shapes=[
                pltpu.VMEM((Ho * Wo, Cout), jnp.float32),
                pltpu.VMEM((Ho + 2, Wo + 2, Cout), jnp.float32),
            ],
        ),
        compiler_params=pltpu.CompilerParams(
            dimension_semantics=("parallel", "parallel", "arbitrary"),
            vmem_limit_bytes=48 * 1024 * 1024,
        ),
    )(patches, wk, bias)

    return jnp.transpose(out, (0, 4, 1, 2, 3))             # back to NCTHW


def video_model_stem_forward(inputs, params, *, kernels, strides, paddings, eps=1e-5):
    """VideoModelStem.forward: list of pathway inputs -> list of pathway outputs."""
    outs = []
    for i, x in enumerate(inputs):
        outs.append(stem_pathway_forward(
            x, params[i]["conv_w"], params[i]["bn"],
            kernel=kernels[i], stride=strides[i], padding=paddings[i], eps=eps))
    return outs


# ---------------------------------------------------------------------------
# Deterministic parameter construction (mirrors the PyTorch module's shapes).
# ---------------------------------------------------------------------------
def init_pathway_params(key, dim_in, dim_out, kernel):
    kT, kH, kW = kernel
    kw_key, g_key, b_key, m_key, v_key = jax.random.split(key, 5)
    fan_in = dim_in * kT * kH * kW
    bound = 1.0 / (fan_in ** 0.5)
    w = jax.random.uniform(kw_key, (dim_out, dim_in, kT, kH, kW),
                           jnp.float32, -bound, bound)
    gamma = jax.random.uniform(g_key, (dim_out,), jnp.float32, 0.5, 1.5)
    beta = jax.random.uniform(b_key, (dim_out,), jnp.float32, -0.5, 0.5)
    mean = jax.random.uniform(m_key, (dim_out,), jnp.float32, -0.5, 0.5)
    var = jax.random.uniform(v_key, (dim_out,), jnp.float32, 0.5, 1.5)
    return {"conv_w": w, "bn": (gamma, beta, mean, var)}


# ---------------------------------------------------------------------------
# Pure-JAX reference (lax.conv, f32 HIGHEST) for the correctness check.
# ---------------------------------------------------------------------------
def reference_pathway_forward(x, conv_w, bn, *, kernel, stride, padding, eps=1e-5):
    kT, kH, kW = kernel
    sT, sH, sW = stride
    pT, pH, pW = padding
    dn = ("NCDHW", "OIDHW", "NCDHW")
    y = jax.lax.conv_general_dilated(
        x, conv_w, (sT, sH, sW),
        [(pT, pT), (pH, pH), (pW, pW)],
        dimension_numbers=dn, precision=jax.lax.Precision.HIGHEST)
    gamma, beta, mean, var = bn
    s = (1, -1, 1, 1, 1)
    y = (y - mean.reshape(s)) / jnp.sqrt(var.reshape(s) + eps) \
        * gamma.reshape(s) + beta.reshape(s)
    y = jnp.maximum(y, 0.0)
    # MaxPool3d kernel (1,3,3), stride (1,2,2), padding (0,1,1)
    Ho, Wo = y.shape[3], y.shape[4]
    Hp = (Ho - 1) // 2 + 1
    Wp = (Wo - 1) // 2 + 1
    ypad = jnp.pad(y, ((0, 0), (0, 0), (0, 0), (1, 1), (1, 1)),
                   constant_values=-jnp.inf)
    pooled = None
    for dh in range(3):
        for dw in range(3):
            win = ypad[:, :, :, dh:dh + 2 * Hp - 1:2, dw:dw + 2 * Wp - 1:2]
            pooled = win if pooled is None else jnp.maximum(pooled, win)
    return pooled


if __name__ == "__main__":
    key = jax.random.PRNGKey(0)
    kx_slow, kx_fast, kp_slow, kp_fast = jax.random.split(key, 4)

    # Two-pathway (SlowFast) stem at small shapes.
    dim_in = [3, 3]
    dim_out = [64, 8]
    kernels = [[1, 7, 7], [5, 7, 7]]
    strides = [[1, 2, 2], [1, 2, 2]]
    paddings = [[0, 3, 3], [2, 3, 3]]

    x_slow = jax.random.normal(kx_slow, (2, 3, 4, 16, 16), dtype=jnp.float32)
    x_fast = jax.random.normal(kx_fast, (2, 3, 16, 16, 16), dtype=jnp.float32)
    inputs = [x_slow, x_fast]

    params = [
        init_pathway_params(kp_slow, dim_in[0], dim_out[0], kernels[0]),
        init_pathway_params(kp_fast, dim_in[1], dim_out[1], kernels[1]),
    ]

    outs = video_model_stem_forward(inputs, params, kernels=kernels,
                                    strides=strides, paddings=paddings)
    outs = jax.block_until_ready(outs)

    expected_shapes = [(2, 64, 4, 4, 4), (2, 8, 16, 4, 4)]
    for i in range(len(inputs)):
        ref = reference_pathway_forward(
            inputs[i], params[i]["conv_w"], params[i]["bn"],
            kernel=kernels[i], stride=strides[i], padding=paddings[i])
        ref = jax.block_until_ready(ref)
        assert outs[i].shape == ref.shape == expected_shapes[i], \
            (outs[i].shape, ref.shape, expected_shapes[i])
        err = float(jnp.max(jnp.abs(outs[i] - ref)))
        tol = 5e-2 * max(1.0, float(jnp.max(jnp.abs(ref))))
        if err > tol:
            raise AssertionError(
                f"pathway {i}: max abs err {err} > tol {tol} (bf16 GEMM)")
    print("KERNEL_OK")
</pallas_src>

<mosaic_0001>
module attributes {stable_mosaic.version = 11 : i64} {
  func.func @_stem_conv_bn_relu_pool_kernel(%arg0: i32, %arg1: i32, %arg2: i32, %arg3: memref<1x1x64x147xbf16, #tpu.memory_space<vmem>>, %arg4: memref<1x147x64xbf16, #tpu.memory_space<vmem>>, %arg5: memref<1x64xf32, #tpu.memory_space<vmem>>, %arg6: memref<1x1x4x4x64xf32, #tpu.memory_space<vmem>>, %arg7: memref<64x64xf32, #tpu.memory_space<vmem>>, %arg8: memref<10x10x64xf32, #tpu.memory_space<vmem>>) attributes {dimension_semantics = [#tpu.dimension_semantics<parallel>, #tpu.dimension_semantics<parallel>, #tpu.dimension_semantics<arbitrary>], iteration_bounds = array<i64: 2, 4, 1>, scalar_prefetch = 0 : i64, scratch_operands = 2 : i64, tpu.core_type = #tpu.core_type<tc>, window_params = [{transform_indices = @transform_0, window_bounds = array<i64: 1, 1, 64, 147>}, {transform_indices = @transform_1, window_bounds = array<i64: 1, 147, 64>}, {pipeline_mode = #tpu.pipeline_mode<synchronous>, transform_indices = @transform_2, window_bounds = array<i64: 1, 64>}, {transform_indices = @transform_3, window_bounds = array<i64: 1, 1, 4, 4, 64>}]} {
    %c0_i32 = arith.constant 0 : i32
    %0 = arith.cmpi eq, %arg2, %c0_i32 : i32
    %1 = arith.extui %0 : i1 to i32
    %c0_i32_0 = arith.constant 0 : i32
    %2 = arith.cmpi ne, %1, %c0_i32_0 : i32
    scf.if %2 {
      %cst_13 = arith.constant 0.000000e+00 : f32
      %14 = vector.broadcast %cst_13 : f32 to vector<64x64xf32>
      %c0_14 = arith.constant 0 : index
      %c0_15 = arith.constant 0 : index
      %15 = vector.load %arg7[%c0_14, %c0_15] : memref<64x64xf32, #tpu.memory_space<vmem>>, vector<64x64xf32>
      tpu.vector_store %arg7[%c0_14, %c0_15], %14 {strides = array<i32>} : memref<64x64xf32, #tpu.memory_space<vmem>>, vector<64x64xf32>,
    } else {
    }
    %c0 = arith.constant 0 : index
    %c0_1 = arith.constant 0 : index
    %3 = vector.load %arg7[%c0, %c0_1] : memref<64x64xf32, #tpu.memory_space<vmem>>, vector<64x64xf32>
    %c0_2 = arith.constant 0 : index
    %c0_3 = arith.constant 0 : index
    %c0_4 = arith.constant 0 : index
    %c0_5 = arith.constant 0 : index
    %4 = vector.load %arg3[%c0_2, %c0_3, %c0_4, %c0_5] : memref<1x1x64x147xbf16, #tpu.memory_space<vmem>>, vector<1x1x64x147xbf16>
    %5 = vector.shape_cast %4 : vector<1x1x64x147xbf16> to vector<64x147xbf16>
    %c0_6 = arith.constant 0 : index
    %c0_7 = arith.constant 0 : index
    %c0_8 = arith.constant 0 : index
    %6 = vector.load %arg4[%c0_6, %c0_7, %c0_8] : memref<1x147x64xbf16, #tpu.memory_space<vmem>>, vector<1x147x64xbf16>
    %7 = vector.shape_cast %6 : vector<1x147x64xbf16> to vector<147x64xbf16>
    %cst = arith.constant dense<0.000000e+00> : vector<64x64xf32>
    %8 = tpu.matmul %5, %7, %cst {dimension_numbers = #tpu.dot_dimension_numbers<[1], [0], [0], [1], [0, 0, 1, 1], [], []>} : vector<64x147xbf16>, vector<147x64xbf16>, vector<64x64xf32> -> vector<64x64xf32>
    %9 = arith.addf %3, %8 : vector<64x64xf32>
    %c0_9 = arith.constant 0 : index
    %c0_10 = arith.constant 0 : index
    %10 = vector.load %arg7[%c0_9, %c0_10] : memref<64x64xf32, #tpu.memory_space<vmem>>, vector<64x64xf32>
    tpu.vector_store %arg7[%c0_9, %c0_10], %9 {strides = array<i32>} : memref<64x64xf32, #tpu.memory_space<vmem>>, vector<64x64xf32>,
    %c0_i32_11 = arith.constant 0 : i32
    %11 = arith.cmpi eq, %arg2, %c0_i32_11 : i32
    %12 = arith.extui %11 : i1 to i32
    %c0_i32_12 = arith.constant 0 : i32
    %13 = arith.cmpi ne, %12, %c0_i32_12 : i32
    scf.if %13 {
      %c0_13 = arith.constant 0 : index
      %c0_14 = arith.constant 0 : index
      %14 = vector.load %arg7[%c0_13, %c0_14] : memref<64x64xf32, #tpu.memory_space<vmem>>, vector<64x64xf32>
      %c0_15 = arith.constant 0 : index
      %c0_16 = arith.constant 0 : index
      %15 = vector.load %arg5[%c0_15, %c0_16] : memref<1x64xf32, #tpu.memory_space<vmem>>, vector<1x64xf32>
      %16 = vector.broadcast %15 : vector<1x64xf32> to vector<64x64xf32>
      %17 = arith.addf %14, %16 : vector<64x64xf32>
      %cst_17 = arith.constant 0.000000e+00 : f32
      %18 = vector.broadcast %cst_17 : f32 to vector<64x64xf32>
      %19 = arith.maximumf %17, %18 : vector<64x64xf32>
      %cst_18 = arith.constant 0.000000e+00 : f32
      %20 = vector.broadcast %cst_18 : f32 to vector<10x10x64xf32>
      %c0_19 = arith.constant 0 : index
      %c0_20 = arith.constant 0 : index
      %c0_21 = arith.constant 0 : index
      %21 = vector.load %arg8[%c0_19, %c0_20, %c0_21] : memref<10x10x64xf32, #tpu.memory_space<vmem>>, vector<10x10x64xf32>
      tpu.vector_store %arg8[%c0_19, %c0_20, %c0_21], %20 {strides = array<i32>} : memref<10x10x64xf32, #tpu.memory_space<vmem>>, vector<10x10x64xf32>,
      %22 = vector.shape_cast %19 : vector<64x64xf32> to vector<8x8x64xf32>
      %c1 = arith.constant 1 : index
      %c1_22 = arith.constant 1 : index
      %c0_23 = arith.constant 0 : index
      %23 = vector.load %arg8[%c1, %c1_22, %c0_23] : memref<10x10x64xf32, #tpu.memory_space<vmem>>, vector<8x8x64xf32>
      tpu.vector_store %arg8[%c1, %c1_22, %c0_23], %22 {strides = array<i32>} : memref<10x10x64xf32, #tpu.memory_space<vmem>>, vector<8x8x64xf32>,
      %c0_24 = arith.constant 0 : index
      %c0_25 = arith.constant 0 : index
      %c0_26 = arith.constant 0 : index
      %24 = tpu.strided_load %arg8[%c0_24, %c0_25, %c0_26] {strides = array<i32: 2, 2, 1>} : memref<10x10x64xf32, #tpu.memory_space<vmem>>, vector<4x4x64xf32>
      %c0_27 = arith.constant 0 : index
      %c1_28 = arith.constant 1 : index
      %c0_29 = arith.constant 0 : index
      %25 = tpu.strided_load %arg8[%c0_27, %c1_28, %c0_29] {strides = array<i32: 2, 2, 1>} : memref<10x10x64xf32, #tpu.memory_space<vmem>>, vector<4x4x64xf32>
      %26 = arith.maximumf %24, %25 : vector<4x4x64xf32>
      %c0_30 = arith.constant 0 : index
      %c2 = arith.constant 2 : index
      %c0_31 = arith.constant 0 : index
      %27 = tpu.strided_load %arg8[%c0_30, %c2, %c0_31] {strides = array<i32: 2, 2, 1>} : memref<10x10x64xf32, #tpu.memory_space<vmem>>, vector<4x4x64xf32>
      %28 = arith.maximumf %26, %27 : vector<4x4x64xf32>
      %c1_32 = arith.constant 1 : index
      %c0_33 = arith.constant 0 : index
      %c0_34 = arith.constant 0 : index
      %29 = tpu.strided_load %arg8[%c1_32, %c0_33, %c0_34] {strides = array<i32: 2, 2, 1>} : memref<10x10x64xf32, #tpu.memory_space<vmem>>, vector<4x4x64xf32>
      %30 = arith.maximumf %28, %29 : vector<4x4x64xf32>
      %c1_35 = arith.constant 1 : index
      %c1_36 = arith.constant 1 : index
      %c0_37 = arith.constant 0 : index
      %31 = tpu.strided_load %arg8[%c1_35, %c1_36, %c0_37] {strides = array<i32: 2, 2, 1>} : memref<10x10x64xf32, #tpu.memory_space<vmem>>, vector<4x4x64xf32>
      %32 = arith.maximumf %30, %31 : vector<4x4x64xf32>
      %c1_38 = arith.constant 1 : index
      %c2_39 = arith.constant 2 : index
      %c0_40 = arith.constant 0 : index
      %33 = tpu.strided_load %arg8[%c1_38, %c2_39, %c0_40] {strides = array<i32: 2, 2, 1>} : memref<10x10x64xf32, #tpu.memory_space<vmem>>, vector<4x4x64xf32>
      %34 = arith.maximumf %32, %33 : vector<4x4x64xf32>
      %c2_41 = arith.constant 2 : index
      %c0_42 = arith.constant 0 : index
      %c0_43 = arith.constant 0 : index
      %35 = tpu.strided_load %arg8[%c2_41, %c0_42, %c0_43] {strides = array<i32: 2, 2, 1>} : memref<10x10x64xf32, #tpu.memory_space<vmem>>, vector<4x4x64xf32>
      %36 = arith.maximumf %34, %35 : vector<4x4x64xf32>
      %c2_44 = arith.constant 2 : index
      %c1_45 = arith.constant 1 : index
      %c0_46 = arith.constant 0 : index
      %37 = tpu.strided_load %arg8[%c2_44, %c1_45, %c0_46] {strides = array<i32: 2, 2, 1>} : memref<10x10x64xf32, #tpu.memory_space<vmem>>, vector<4x4x64xf32>
      %38 = arith.maximumf %36, %37 : vector<4x4x64xf32>
      %c2_47 = arith.constant 2 : index
      %c2_48 = arith.constant 2 : index
      %c0_49 = arith.constant 0 : index
      %39 = tpu.strided_load %arg8[%c2_47, %c2_48, %c0_49] {strides = array<i32: 2, 2, 1>} : memref<10x10x64xf32, #tpu.memory_space<vmem>>, vector<4x4x64xf32>
      %40 = arith.maximumf %38, %39 : vector<4x4x64xf32>
      %c0_50 = arith.constant 0 : index
      %c0_51 = arith.constant 0 : index
      %c0_52 = arith.constant 0 : index
      %c0_53 = arith.constant 0 : index
      %c0_54 = arith.constant 0 : index
      %41 = vector.load %arg6[%c0_50, %c0_51, %c0_52, %c0_53, %c0_54] : memref<1x1x4x4x64xf32, #tpu.memory_space<vmem>>, vector<1x1x4x4x64xf32>
      %42 = vector.shape_cast %41 : vector<1x1x4x4x64xf32> to vector<4x4x64xf32>
      %43 = vector.shape_cast %40 : vector<4x4x64xf32> to vector<1x1x4x4x64xf32>
      tpu.vector_store %arg6[%c0_50, %c0_51, %c0_52, %c0_53, %c0_54], %43 {strides = array<i32>} : memref<1x1x4x4x64xf32, #tpu.memory_space<vmem>>, vector<1x1x4x4x64xf32>,
    } else {
    }
    return
  }
  func.func @transform_0(%arg0: i32, %arg1: i32, %arg2: i32) -> (i32, i32, i32, i32) {
    %c1_i32 = arith.constant 1 : i32
    %0 = arith.muli %arg1, %c1_i32 : i32
    %1 = arith.addi %0, %arg2 : i32
    %c0_i32 = arith.constant 0 : i32
    %c0_i32_0 = arith.constant 0 : i32
    %c0_i32_1 = arith.constant 0 : i32
    return %arg0, %1, %c0_i32, %c0_i32_0 : i32, i32, i32, i32
  }
  func.func @transform_1(%arg0: i32, %arg1: i32, %arg2: i32) -> (i32, i32, i32) {
    %c0_i32 = arith.constant 0 : i32
    %c0_i32_0 = arith.constant 0 : i32
    %c0_i32_1 = arith.constant 0 : i32
    return %arg2, %c0_i32, %c0_i32_0 : i32, i32, i32
  }
  func.func @transform_2(%arg0: i32, %arg1: i32, %arg2: i32) -> (i32, i32) {
    %c0_i32 = arith.constant 0 : i32
    %c0_i32_0 = arith.constant 0 : i32
    %c0_i32_1 = arith.constant 0 : i32
    return %c0_i32, %c0_i32_0 : i32, i32
  }
  func.func @transform_3(%arg0: i32, %arg1: i32, %arg2: i32) -> (i32, i32, i32, i32, i32) {
    %c0_i32 = arith.constant 0 : i32
    %c0_i32_0 = arith.constant 0 : i32
    %c0_i32_1 = arith.constant 0 : i32
    %c0_i32_2 = arith.constant 0 : i32
    return %arg0, %arg1, %c0_i32, %c0_i32_0, %c0_i32_1 : i32, i32, i32, i32, i32
  }
}

</mosaic_0001>

<bundles_post_ra>
// kernel: tpu_custom_call.1
= control target key start
LH: loop header
LB: loop body
LE: loop exit
PB: predicated region body
PF: predicated region fallthrough
CT: control target
= control target key end

     0   :  { %8 = vsyncpa [#allocation5], 0  ;;  %s1435_s0 = inlined_call_operand.hbm [shape: bf16[2,4,64,147], index: 0, kind: input, shape index: {}]   ;;  %s1436_s1 = inlined_call_operand.vmem [shape: bf16[1,147,64], index: 1, kind: input, shape index: {}]   ;;  %s1437_s2 = inlined_call_operand.vmem [shape: f32[1,64], index: 2, kind: input, shape index: {}]   ;;  %s1438_s3 = inlined_call_operand.hbm [shape: f32[2,4,4,4,64], index: 3, kind: output, shape index: {}]  }
   0x1   :  { %10 = vsyncpa [#allocation5 + $0x1], 0 }
   0x2   :  { %11 = vsyncpa [#allocation6], 0 }
   0x3   :  { %13 = vsyncpa [#allocation6 + $0x1], 0  ;;  %s1127_s12 = smov 0   ;;  %s1129_s13 = smov 0  }
   0x4   :  { %s1131_s14 = smov 0   ;;  %s1133_s15 = smov 0  }
   0x5   :  { %s1135_s16 = smov 0   ;;  %s1137_s17 = smov 0  }
   0x6   :  { %s1139_s18 = smov 0   ;;  %s1141_s19 = smov 0  }
   0x7 LB: > { %s800_s20 = sadd.s32 4294967295, %s1096_s19   ;;  %s801_s21 = sadd.s32 4294967294, %s1096_s19   ;;  %s1096_s19 = sphi %s1141_s19, %s19_s19   ;;  %s1092_s18 = sphi %s1139_s18, %s1456_s18   ;;  %s1088_s17 = sphi %s1137_s17, %s1455_s17   ;;  %s1084_s16 = sphi %s1135_s16, %s1454_s16   ;;  %s1080_s15 = sphi %s1133_s15, %s1453_s15   ;;  %s1076_s14 = sphi %s1131_s14, %s1452_s14   ;;  %s1072_s13 = sphi %s1129_s13, %s1451_s13   ;;  %s1068_s12 = sphi %s1127_s12, %s1450_s12  }
   0x8   : > { %s34_s22 = sadd.s32 1, %s1088_s17  ;;  %s38_s23 = sadd.s32 1, %s1092_s18 }
   0x9   : > { %p36_p0 = scmp.ge.s32.totalorder %s34_s22, 4  ;;  %s49_s24 = sadd.s32 1, %s1076_s14 }
   0xa   : > { %p56_p1 = scmp.ne.s32.totalorder %s1076_s14, %s1072_s13  ;;  %p57_p2 = scmp.eq.s32.totalorder %s1096_s19, 0 }
   0xb   : > { %s1458_s22 = smov (%p36_p0, %s34_s22), 0  ;;  %s1460_s23 = smov (!%p36_p0, %s38_s23), %s1092_s18 }
   0xc   : > { %s45_s25 = ssub.s32 %s1088_s17, %s1458_s22  ;;  %p1180_p3 = por %p57_p2, %p56_p1 }
   0xd   : > { %p40_p4 = scmp.ge.s32.totalorder %s1460_s23, 2  ;;  %p62_p5 = scmp.ne.s32.totalorder %s1072_s13, %s1068_s12 }
   0xe   : > { %p63_p6 = scmp.eq.s32.totalorder %s800_s20, 0  ;;  %p135_p7 = scmp.eq.s32.totalorder %s800_s20, 7 }
   0xf   : > { %s1462_s23 = smov (%p40_p4, %s1460_s23), 0  ;;  %p141_p10 = scmp.eq.s32.totalorder %s801_s21, 7 }
  0x10   : > { %1442 = sst [smem:[#allocation10_spill]] %s1462_s23  ;;  %p1188_p8 = por %p63_p6, %p62_p5 }
  0x11   : > { %p1192_p9 = por %p135_p7, %p56_p1  ;;  %s44_s29 = ssub.s32 %s1092_s18, %s1462_s23 }
  0x12   : > { %s46_s30 = sor.u32 %s45_s25, %s44_s29  ;;  %p1198_p12 = por %p141_p10, %p62_p5 }
  0x13   : > { %s1444_s28 = scalar_select %p1192_p9, 1, 0 }
  0x14   : > { %p47_p11 = scmp.eq.s32.totalorder %s46_s30, 0  ;;  %p873_p13 = scmp.lt.s32.totalorder %s1096_s19, 8 }
  0x15   : > { %s1445_s4 = scalar_select %p1198_p12, 1, 0 }
  0x16   : > { %s172_s5 = sand.u32 1, %s1076_s14   ;;  %s806_s8 = sshll.u32 %s1088_s17, 4 }
  0x17   : > { %s1205_s6 = scalar_select %p47_p11, %s1076_s14, %s49_s24  }
  0x18   : > { %s805_s7 = sshll.u32 %s172_s5, 6  ;;  %s807_s9 = sshll.u32 %s1092_s18, 6 }
  0x19   : > { %s176_s10 = scalar_lea.vmem [#allocation4], %s805_s7  ;;  %s183_s20 = sadd.s32 %s807_s9, %s806_s8 }
  0x1a   : > { %s186_s11 = sshll.u32 %s176_s10, 4  ;;  %s808_s23 = sshll.u32 %s183_s20, 6  ;;  %s1209_s11 = int_to_ptr.vmem [resolvable:$true] %s186_s11 }
  0x1b   : > { %p1213_p0 = pnand %p873_p13, %p1180_p3  ;;  %s1220_s24 = scalar_lea.hbm %s1435_s0, %s808_s23 }
  0x1c   : > { %s1222_s30 = scalar_lea.sflag [#allocation5], %s172_s5  ;;  %s968_s7 = scalar_lea.hbm %s1220_s24, 1024 }
  0x1d   : > { %p969_p1 = scmp.ne.s32.totalorder %s1220_s24, %s968_s7  ;;  %p970_p2 = pneg %p1213_p0 }
  0x1e   : > { %s973_s9 = scalar_lea.hbm %s1435_s0, 8192  ;;  %p974_p5 = scmp.lt.u32.totalorder %s1220_s24, %s1435_s0 }
  0x1f   : > { %p971_p3 = pnand %p970_p2, %p969_p1  ;;  %p975_p6 = scmp.lt.u32.totalorder %s973_s9, %s968_s7 }
  0x20   : > { %p977_p10 = scmp.lt.u32.totalorder %s968_s7, %s1220_s24 }
  0x21   : > { %p972_p4 = pneg %p971_p3  ;;  %p976_p7 = por %p975_p6, %p974_p5 }
  0x23   : > { %p978_p11 = por %p977_p10, %p976_p7 }
  0x25   : > { %p979_p13 = pnand %p978_p11, %p972_p4 }
  0x27   : > { %982 = shalt.err (!%p979_p13)
}
  0x28   : > { %s983_s5 = scalar_lea.vmem %s1209_s11, 1024  ;;  %s1098_s20 = smov [#allocation4]  }
  0x29   : > { %p984_p1 = scmp.ne.s32.totalorder %s1209_s11, %s983_s5  ;;  %s988_s25 = sshll.u32 %s1098_s20, 4  ;;  %s989_s25 = int_to_ptr.vmem [resolvable:$false] %s988_s25 }
  0x2a   : > { %s990_s29 = scalar_lea.vmem %s989_s25, 2048  ;;  %p991_p9 = scmp.lt.s32.totalorder %s1209_s11, %s989_s25 }
  0x2b   : > { %p986_p3 = pnand %p984_p1, %p970_p2  ;;  %p992_p5 = scmp.lt.s32.totalorder %s990_s29, %s983_s5 }
  0x2d   : > { %p987_p12 = pneg %p986_p3  ;;  %p993_p6 = por %p992_p5, %p991_p9 }
  0x2f   : > { %p994_p7 = pnand %p993_p6, %p987_p12 }
  0x31   : > { %997 = shalt.err (!%p994_p7)
}
  0x32   : > { %s1099_s7 = smov 128   ;;  %s1100_s26 = smov 8  }
  0x33   : > { %868 = dma.hbm_to_vmem [thread:$0]  (!%p1213_p0), %s1220_s24, 1024, %s1209_s11, %s1222_s30, %s1099_s7, %s1099_s7, %s1100_s26  }
  0x34   : > { %p809_p2 = scmp.ge.s32.totalorder %s1096_s19, 1  ;;  %p194_p4 = scmp.lt.s32.totalorder %s1096_s19, 9 }
  0x36   : > { %p195_p10 = pnand %p809_p2, %p194_p4 }
  0x37   : > { %s1253_s8 = sand.u32 (!%p195_p10), 1, %s1072_s13  }
  0x38   : > { %198 = sbr.rel (%p195_p10) target bundleno = 380 (0x17c), region = 32  ;;  %s810_s9 = sshll.u32 (!%p195_p10), %s1253_s8, 6 }
  0x39   : > { %s201_s23 = scalar_lea.sflag (!%p195_p10), [#allocation5], %s1253_s8  ;;  %s1257_s10 = scalar_lea.vmem (!%p195_p10), [#allocation4], %s810_s9 }
  0x3f   : > { %1059 = dma.done.wait (%p1188_p8), %s201_s23, 1024  }
  0x40   : > { %1061 = vsyncadd (%p1188_p8), %s201_s23, 4294966272  ;;  %vm243_vm0 = vcmask 523264   ;;  %v1101_v0 = vmov 0.0   ;;  %v1102_v1 = vmov 0   ;;  %v946_v2 = vld [vmem:[%s1436_s1] sm:$0xff]   ;;  %v947_v3 = vld [vmem:[%s1436_s1 + $0x8] sm:$0xff]  }
  0x41   : > { %244 = vst.msk [vmem:[#allocation2] sm:$0xff] %vm243_vm0, %v1101_v0  ;;  %245 = vst.msk [vmem:[#allocation2 + $0x8] sm:$0xff] %vm243_vm0, %v1101_v0  ;;  %400 = vmatprep.subr.bf16.mxu0 %v1102_v1  ;;  %841 = vmatprep.subr.bf16.mxu1 %v1102_v1  ;;  %v948_v4 = vld [vmem:[%s1436_s1 + $0x10] sm:$0xff]   ;;  %vm380_vm1 = vcmask 154624   ;;  %v949_v5 = vld [vmem:[%s1436_s1 + $0x18] sm:$0xff]   ;;  %vm393_vm2 = vcmask 1040384  }
  0x42   : > { %246 = vst.msk [vmem:[#allocation2 + $0x10] sm:$0xff] %vm243_vm0, %v1101_v0  ;;  %247 = vst.msk [vmem:[#allocation2 + $0x18] sm:$0xff] %vm243_vm0, %v1101_v0  ;;  %401 = vmatpush1.bf16.msra.mxu0 %v946_v2  ;;  %851 = vmatpush1.bf16.msra.mxu1 %v946_v2  ;;  %v958_v6 = vld [vmem:[%s1257_s10 + $0x4] ss:$8 sps:$4 sm:$0xff]   ;;  %v952_v10 = vld [vmem:[%s1436_s1 + $0x30] sm:$0xff]   ;;  %vm394_vm3 = vcmask 1041408  }
  0x43   : > { %248 = vst.msk [vmem:[#allocation2 + $0x20] sm:$0xff] %vm243_vm0, %v1101_v0  ;;  %249 = vst.msk [vmem:[#allocation2 + $0x28] sm:$0xff] %vm243_vm0, %v1101_v0  ;;  %402 = vmatprep.subr.bf16.mxu0 %v1102_v1  ;;  %842 = vmatprep.subr.bf16.mxu1 %v1102_v1  ;;  %v961_v7 = vld [vmem:[%s1257_s10 + $0x24] ss:$8 sps:$4 sm:$0xff]   ;;  %v953_v11 = vld [vmem:[%s1436_s1 + $0x38] sm:$0xff]   ;;  %v1103_v12 = vmov 65535  }
  0x44   : > { %250 = vst.msk [vmem:[#allocation2 + $0x30] sm:$0xff] %vm243_vm0, %v1101_v0  ;;  %251 = vst.msk [vmem:[#allocation2 + $0x38] sm:$0xff] %vm243_vm0, %v1101_v0  ;;  %830 = vmatprep.mubr.msk.bf16.mxu0 %vm380_vm1, %v958_v6  ;;  %v950_v8 = vld [vmem:[%s1436_s1 + $0x20] sm:$0xff]   ;;  %832 = vmatprep.mubr.msk.bf16.mxu1 %vm380_vm1, %v961_v7  ;;  %v951_v9 = vld [vmem:[%s1436_s1 + $0x28] sm:$0xff]   ;;  %v395_v13 = vsel %vm393_vm2, 4294967295, %v1103_v12  ;;  %vm517_vm4 = vcmask 517120  }
  0x45   : > { %516 = vst.msk [vmem:[#allocation3] sm:$0xff] %vm243_vm0, %v1101_v0  ;;  %519 = vst.msk [vmem:[#allocation3 + $0x10] sm:$0xff] %vm243_vm0, %v1101_v0  ;;  %v954_v14 = vld [vmem:[%s1436_s1 + $0x40] sm:$0xff]   ;;  %v955_v15 = vld [vmem:[%s1436_s1 + $0x48] ss:$0 sps:$4 sm:$0x33]  }
  0x46   : > { %521 = vst.msk [vmem:[#allocation3 + $0x20] sm:$0xff] %vm243_vm0, %v1101_v0  ;;  %523 = vst.msk [vmem:[#allocation3 + $0x30] sm:$0xff] %vm243_vm0, %v1101_v0  ;;  %403 = vmatpush1.bf16.msra.mxu0 %v947_v3  ;;  %852 = vmatpush1.bf16.msra.mxu1 %v947_v3  ;;  %v396_v16 = vsel %vm394_vm3, %v395_v13, 0  ;;  %v956_v18 = vld [vmem:[%s1257_s10] ss:$8 sps:$4 sm:$0xff]   ;;  %s811_s29 = sshll.u32 %s1253_s8, 4 }
  0x47   : > { %525 = vst.msk [vmem:[#allocation3 + $0x40] sm:$0xff] %vm243_vm0, %v1101_v0  ;;  %527 = vst.msk [vmem:[#allocation3 + $0x50] sm:$0xff] %vm243_vm0, %v1101_v0  ;;  %404 = vmatprep.subr.bf16.mxu0 %v1102_v1  ;;  %843 = vmatprep.subr.bf16.mxu1 %v1102_v1  ;;  %v398_v17 = vand.u32 %v955_v15, %v396_v16  ;;  %v959_v19 = vld [vmem:[%s1257_s10 + $0x20] ss:$8 sps:$4 sm:$0xff]   ;;  %v962_v20 = vld [vmem:[%s1257_s10 + $0x14] ss:$8 sps:$4 sm:$0xff]  }
  0x48   : > { %529 = vst.msk [vmem:[#allocation3 + $0x60] sm:$0xff] %vm243_vm0, %v1101_v0  ;;  %531 = vst.msk [vmem:[#allocation3 + $0x70] sm:$0xff] %vm243_vm0, %v1101_v0  ;;  %v964_v21 = vld [vmem:[%s1257_s10 + $0x34] ss:$8 sps:$4 sm:$0xff]   ;;  %v966_v22 = vld [vmem:[%s1257_s10 + $0x10] ss:$8 sps:$4 sm:$0xff]  }
  0x49   : > { %533 = vst.msk [vmem:[#allocation3 + $0x80] sm:$0xff] %vm243_vm0, %v1101_v0  ;;  %v967_v23 = vld [vmem:[%s1257_s10 + $0x30] ss:$8 sps:$4 sm:$0xff]   ;;  %v252_v24 = vld [vmem:[#allocation2] sm:$0xff]  ;;  %v253_v27 = vld [vmem:[#allocation2 + $0x8] sm:$0xff]  ;;  %vm648_vm5 = vcmask 519168  }
  0x4a   : > { %405 = vmatpush1.bf16.msra.mxu0 %v948_v4  ;;  %853 = vmatpush1.bf16.msra.mxu1 %v948_v4  ;;  %520 = vst.msk [vmem:[#allocation3 + $0x18] sm:$0x3] %vm517_vm4, %v1101_v0  ;;  %518 = vst.msk [vmem:[#allocation3 + $0x8] sm:$0x3] %vm517_vm4, %v1101_v0  ;;  %v256_v25 = vld [vmem:[#allocation2 + $0x20] sm:$0xff]  ;;  %v257_v29 = vld [vmem:[#allocation2 + $0x28] sm:$0xff] }
  0x4b   : > { %406 = vmatprep.subr.bf16.mxu0 %v1102_v1  ;;  %844 = vmatprep.subr.bf16.mxu1 %v1102_v1  ;;  %522 = vst.msk [vmem:[#allocation3 + $0x28] sm:$0x3] %vm517_vm4, %v1101_v0  ;;  %524 = vst.msk [vmem:[#allocation3 + $0x38] sm:$0x3] %vm517_vm4, %v1101_v0  ;;  %v254_v40 = vld [vmem:[#allocation2 + $0x10] sm:$0xff]  ;;  %v255_v45 = vld [vmem:[#allocation2 + $0x18] sm:$0xff] }
  0x4c   : > { %526 = vst.msk [vmem:[#allocation3 + $0x48] sm:$0x3] %vm517_vm4, %v1101_v0  ;;  %528 = vst.msk [vmem:[#allocation3 + $0x58] sm:$0x3] %vm517_vm4, %v1101_v0  ;;  %v258_v41 = vld [vmem:[#allocation2 + $0x30] sm:$0xff]  ;;  %v259_v46 = vld [vmem:[#allocation2 + $0x38] sm:$0xff] }
  0x4d   : > { %530 = vst.msk [vmem:[#allocation3 + $0x68] sm:$0x3] %vm517_vm4, %v1101_v0  ;;  %532 = vst.msk [vmem:[#allocation3 + $0x78] sm:$0x3] %vm517_vm4, %v1101_v0  ;;  %v834_v42 = vld [vmem:[%s1437_s2] ss:$0 sm:$0xff] }
  0x4e   : > { %407 = vmatpush1.bf16.msra.mxu0 %v949_v5  ;;  %854 = vmatpush1.bf16.msra.mxu1 %v949_v5  ;;  %534 = vst.msk [vmem:[#allocation3 + $0x88] sm:$0x3] %vm517_vm4, %v1101_v0  ;;  %v546_v61 = vld [vmem:[#allocation3] ss:$2 sm:$0xf]  ;;  %s836_s7 = sshll.u32 %s1080_s15, 2 }
  0x4f   : > { %408 = vmatprep.subr.bf16.mxu0 %v1102_v1  ;;  %845 = vmatprep.subr.bf16.mxu1 %v1102_v1  ;;  %v554_v0 = vld [vmem:[#allocation3 + $0x1] ss:$2 sm:$0xf]  ;;  %s837_s26 = sshll.u32 %s1084_s16, 4  ;;  %s231_s15 = scalar_lea.vmem [#allocation7], %s811_s29 }
  0x50   : > { %v561_v7 = vmax.f32 %v546_v61, %v554_v0  ;;  %s666_s16 = sadd.s32 %s837_s26, %s836_s7  ;;  %s669_s9 = sshll.u32 %s231_s15, 4  ;;  %s1375_s9 = int_to_ptr.vmem [resolvable:$true] %s669_s9 }
  0x51   : > { %s838_s23 = sshll.u32 %s666_s16, 6  ;;  %s654_s24 = scalar_lea.sflag [#allocation6], %s1253_s8 }
  0x52   : > { %409 = vmatpush1.bf16.msra.mxu0 %v950_v8  ;;  %855 = vmatpush1.bf16.msra.mxu1 %v950_v8  ;;  %v566_v8 = vld [vmem:[#allocation3 + $0x2] ss:$2 sm:$0xf]  ;;  %s1380_s21 = scalar_lea.hbm %s1438_s3, %s838_s23  ;;  %s998_s30 = scalar_lea.vmem %s1375_s9, 256 }
  0x53   : > { %410 = vmatprep.subr.bf16.mxu0 %v1102_v1  ;;  %846 = vmatprep.subr.bf16.mxu1 %v1102_v1  ;;  %v573_v13 = vmax.f32 %v561_v7, %v566_v8  ;;  %p999_p8 = scmp.ne.s32.totalorder %s1375_s9, %s998_s30  ;;  %p1447_p9 = scmp.ne.s32.totalorder %s1444_s28, 0 }
  0x54   : > { %s1104_s5 = smov [#allocation7]  }
  0x55   : > { %p1000_p12 = pnand %p999_p8, %p1447_p9  ;;  %s1002_s20 = sshll.u32 %s1104_s5, 4  ;;  %s1003_s20 = int_to_ptr.vmem [resolvable:$false] %s1002_s20 }
  0x56   : > { %411 = vmatpush1.bf16.msra.mxu0 %v951_v9  ;;  %856 = vmatpush1.bf16.msra.mxu1 %v951_v9  ;;  %s1004_s10 = scalar_lea.vmem %s1003_s20, 512  ;;  %p1005_p11 = scmp.lt.s32.totalorder %s1375_s9, %s1003_s20 }
  0x57   : > { %412 = vmatprep.subr.bf16.mxu0 %v1102_v1  ;;  %847 = vmatprep.subr.bf16.mxu1 %v1102_v1  ;;  %p1001_p0 = pneg %p1000_p12  ;;  %p1006_p13 = scmp.lt.s32.totalorder %s1004_s10, %s998_s30 }
  0x59   : > { %p1007_p1 = por %p1006_p13, %p1005_p11 }
  0x5a   : > { %413 = vmatpush1.bf16.msra.mxu0 %v952_v10  ;;  %857 = vmatpush1.bf16.msra.mxu1 %v952_v10 }
  0x5b   : > { %414 = vmatprep.subr.bf16.mxu0 %v1102_v1  ;;  %848 = vmatprep.subr.bf16.mxu1 %v1102_v1  ;;  %p1008_p3 = pnand %p1007_p1, %p1001_p0 }
  0x5e   : > { %415 = vmatpush1.bf16.msra.mxu0 %v953_v11  ;;  %858 = vmatpush1.bf16.msra.mxu1 %v953_v11 }
  0x5f   : > { %416 = vmatprep.subr.bf16.mxu0 %v1102_v1  ;;  %849 = vmatprep.subr.bf16.mxu1 %v1102_v1 }
  0x62   : > { %417 = vmatpush1.bf16.msra.mxu0 %v954_v14  ;;  %859 = vmatpush1.bf16.msra.mxu1 %v954_v14 }
  0x63   : > { %418 = vmatprep.subr.bf16.mxu0 %v1102_v1  ;;  %850 = vmatprep.subr.bf16.mxu1 %v1102_v1 }
  0x66   : > { %419 = vmatpush1.bf16.msra.mxu0 %v398_v17  ;;  %860 = vmatpush1.bf16.msra.mxu1 %v398_v17 }
  0x69   : > { %433 = vmatmul.mubr.bf16.vlgmr.msra.gmra.mrb[0].mxu0 %v956_v18  ;;  %449 = vmatmul.mubr.bf16.vlgmr.msra.gmra.mrb[0].mxu1 %v959_v19 }
  0x6a   : > { %831 = vmatprep.mubr.msk.bf16.mxu0 %vm380_vm1, %v962_v20  ;;  %833 = vmatprep.mubr.msk.bf16.mxu1 %vm380_vm1, %v964_v21 }
  0x71   : > { %441 = vmatmul.mubr.bf16.gmra.mrb[4].mxu0 %v966_v22  ;;  %457 = vmatmul.mubr.bf16.gmra.mrb[4].mxu1 %v967_v23 }
 0x13c   : > { %v434_v26 = vpop.f32.mrb[0].mxu0  ;;  %v450_v28 = vpop.f32.mrb[0].mxu1 }
 0x13d   : > { %v465_v30 = vadd.f32 %v434_v26, %v252_v24  ;;  %v436_v31 = vpop.f32.mrb[1].mxu0  ;;  %v469_v32 = vadd.f32 %v450_v28, %v256_v25  ;;  %v452_v33 = vpop.f32.mrb[1].mxu1 }
 0x13e   : > { %v437_v34 = vpop.f32.mrb[2].mxu0  ;;  %v453_v35 = vpop.f32.mrb[2].mxu1 }
 0x13f   : > { %474 = vst.msk [vmem:[#allocation2] sm:$0xff] %vm243_vm0, %v465_v30  ;;  %v466_v36 = vadd.f32 %v437_v34, %v253_v27  ;;  %478 = vst.msk [vmem:[#allocation2 + $0x20] sm:$0xff] %vm243_vm0, %v469_v32  ;;  %v439_v37 = vpop.f32.mrb[3].mxu0  ;;  %v470_v38 = vadd.f32 %v453_v35, %v257_v29  ;;  %v455_v39 = vpop.f32.mrb[3].mxu1 }
 0x141   : > { %475 = vst.msk [vmem:[#allocation2 + $0x8] sm:$0xff] %vm243_vm0, %v466_v36  ;;  %479 = vst.msk [vmem:[#allocation2 + $0x28] sm:$0xff] %vm243_vm0, %v470_v38 }
 0x144   : > { %v442_v43 = vpop.f32.mrb[4].mxu0  ;;  %v458_v44 = vpop.f32.mrb[4].mxu1 }
 0x145   : > { %v467_v47 = vadd.f32 %v442_v43, %v254_v40  ;;  %v471_v48 = vadd.f32 %v458_v44, %v258_v41  ;;  %v444_v49 = vpop.f32.mrb[5].mxu0  ;;  %v460_v50 = vpop.f32.mrb[5].mxu1 }
 0x146   : > { %v485_v51 = vld [vmem:[#allocation2] sm:$0xff]  ;;  %v445_v53 = vpop.f32.mrb[6].mxu0  ;;  %v461_v54 = vpop.f32.mrb[6].mxu1 }
 0x147   : > { %v489_v52 = vld [vmem:[#allocation2 + $0x20] sm:$0xff]  ;;  %v500_v55 = vadd.f32 %v834_v42, %v485_v51  ;;  %476 = vst.msk [vmem:[#allocation2 + $0x10] sm:$0xff] %vm243_vm0, %v467_v47  ;;  %480 = vst.msk [vmem:[#allocation2 + $0x30] sm:$0xff] %vm243_vm0, %v471_v48  ;;  %v468_v57 = vadd.f32 %v445_v53, %v255_v45  ;;  %v447_v58 = vpop.f32.mrb[7].mxu0  ;;  %v472_v59 = vadd.f32 %v461_v54, %v259_v46  ;;  %v463_v60 = vpop.f32.mrb[7].mxu1 }
 0x148   : > { %v504_v56 = vadd.f32 %v834_v42, %v489_v52  ;;  %v486_v62 = vld [vmem:[#allocation2 + $0x8] sm:$0xff] }
 0x149   : > { %v490_v63 = vld [vmem:[#allocation2 + $0x28] sm:$0xff]  ;;  %v508_v1 = vmax.f32 %v500_v55, 0.0  ;;  %v501_v2 = vadd.f32 %v834_v42, %v486_v62  ;;  %477 = vst.msk [vmem:[#allocation2 + $0x18] sm:$0xff] %vm243_vm0, %v468_v57  ;;  %481 = vst.msk [vmem:[#allocation2 + $0x38] sm:$0xff] %vm243_vm0, %v472_v59 }
 0x14a   : > { %v512_v3 = vmax.f32 %v504_v56, 0.0  ;;  %v505_v4 = vadd.f32 %v834_v42, %v490_v63 }
 0x14b   : > { %538 = vst.msk [vmem:[#allocation3 + $0x11] sm:$0xff] %vm243_vm0, %v508_v1  ;;  %v509_v5 = vmax.f32 %v501_v2, 0.0 }
 0x14c   : > { %542 = vst.msk [vmem:[#allocation3 + $0x51] sm:$0xff] %vm243_vm0, %v512_v3  ;;  %v513_v6 = vmax.f32 %v505_v4, 0.0 }
 0x14d   : > { %539 = vst.msk [vmem:[#allocation3 + $0x21] sm:$0xff] %vm243_vm0, %v509_v5 }
 0x14e   : > { %543 = vst.msk [vmem:[#allocation3 + $0x61] sm:$0xff] %vm243_vm0, %v513_v6  ;;  %v487_v9 = vld [vmem:[#allocation2 + $0x10] sm:$0xff] }
 0x14f   : > { %v491_v10 = vld [vmem:[#allocation2 + $0x30] sm:$0xff]  ;;  %v502_v11 = vadd.f32 %v834_v42, %v487_v9 }
 0x150   : > { %v506_v12 = vadd.f32 %v834_v42, %v491_v10  ;;  %v488_v14 = vld [vmem:[#allocation2 + $0x18] sm:$0xff] }
 0x151   : > { %v492_v15 = vld [vmem:[#allocation2 + $0x38] sm:$0xff]  ;;  %v510_v16 = vmax.f32 %v502_v11, 0.0  ;;  %v503_v18 = vadd.f32 %v834_v42, %v488_v14 }
 0x152   : > { %v514_v17 = vmax.f32 %v506_v12, 0.0  ;;  %v507_v19 = vadd.f32 %v834_v42, %v492_v15  ;;  %v577_v20 = vld [vmem:[#allocation3 + $0x10] ss:$2 sm:$0xf] }
 0x153   : > { %540 = vst.msk [vmem:[#allocation3 + $0x31] sm:$0xff] %vm243_vm0, %v510_v16  ;;  %v511_v21 = vmax.f32 %v503_v18, 0.0  ;;  %v584_v23 = vmax.f32 %v573_v13, %v577_v20  ;;  %v589_v24 = vld [vmem:[#allocation3 + $0x11] ss:$2 sm:$0xf] }
 0x154   : > { %544 = vst.msk [vmem:[#allocation3 + $0x71] sm:$0xff] %vm243_vm0, %v514_v17  ;;  %v515_v22 = vmax.f32 %v507_v19, 0.0  ;;  %v548_v25 = vld [vmem:[#allocation3 + $0x20] ss:$2 sm:$0xf] }
 0x155   : > { %v552_v26 = vld [vmem:[#allocation3 + $0x60] ss:$2 sm:$0xf]  ;;  %541 = vst.msk [vmem:[#allocation3 + $0x41] sm:$0xff] %vm243_vm0, %v511_v21  ;;  %v596_v29 = vmax.f32 %v584_v23, %v589_v24 }
 0x156   : > { %545 = vst.msk [vmem:[#allocation3 + $0x81] sm:$0xff] %vm243_vm0, %v515_v22  ;;  %v556_v27 = vld [vmem:[#allocation3 + $0x21] ss:$2 sm:$0xf] }
 0x157   : > { %v560_v28 = vld [vmem:[#allocation3 + $0x61] ss:$2 sm:$0xf]  ;;  %v562_v30 = vmax.f32 %v548_v25, %v556_v27  ;;  %v572_v32 = vld [vmem:[#allocation3 + $0x62] ss:$2 sm:$0xf] }
 0x158   : > { %v564_v31 = vmax.f32 %v552_v26, %v560_v28  ;;  %v601_v33 = vld [vmem:[#allocation3 + $0x12] ss:$2 sm:$0xf]  ;;  %v568_v34 = vld [vmem:[#allocation3 + $0x22] ss:$2 sm:$0xf] }
 0x159   : > { %v608_v36 = vmax.f32 %v596_v29, %v601_v33  ;;  %v574_v37 = vmax.f32 %v562_v30, %v568_v34  ;;  %v613_v38 = vld [vmem:[#allocation3 + $0x20] ss:$2 sm:$0xf]  ;;  %v625_v52 = vld [vmem:[#allocation3 + $0x21] ss:$2 sm:$0xf] }
 0x15a   : > { %v576_v35 = vmax.f32 %v564_v31, %v572_v32  ;;  %v579_v39 = vld [vmem:[#allocation3 + $0x30] ss:$2 sm:$0xf]  ;;  %v591_v44 = vld [vmem:[#allocation3 + $0x31] ss:$2 sm:$0xf] }
 0x15b   : > { %v583_v40 = vld [vmem:[#allocation3 + $0x70] ss:$2 sm:$0xf]  ;;  %v620_v41 = vmax.f32 %v608_v36, %v613_v38  ;;  %v585_v42 = vmax.f32 %v574_v37, %v579_v39  ;;  %v595_v45 = vld [vmem:[#allocation3 + $0x71] ss:$2 sm:$0xf] }
 0x15c   : > { %v587_v43 = vmax.f32 %v576_v35, %v583_v40  ;;  %v550_v46 = vld [vmem:[#allocation3 + $0x40] ss:$2 sm:$0xf]  ;;  %v558_v47 = vld [vmem:[#allocation3 + $0x41] ss:$2 sm:$0xf] }
 0x15d   : > { %v563_v48 = vmax.f32 %v550_v46, %v558_v47  ;;  %v570_v49 = vld [vmem:[#allocation3 + $0x42] ss:$2 sm:$0xf]  ;;  %v597_v50 = vmax.f32 %v585_v42, %v591_v44  ;;  %v603_v53 = vld [vmem:[#allocation3 + $0x32] ss:$2 sm:$0xf]  ;;  %v632_v55 = vmax.f32 %v620_v41, %v625_v52 }
 0x15e   : > { %v599_v51 = vmax.f32 %v587_v43, %v595_v45  ;;  %v607_v54 = vld [vmem:[#allocation3 + $0x72] ss:$2 sm:$0xf]  ;;  %v619_v59 = vld [vmem:[#allocation3 + $0x80] ss:$2 sm:$0xf] }
 0x15f   : > { %v575_v56 = vmax.f32 %v563_v48, %v570_v49  ;;  %v609_v57 = vmax.f32 %v597_v50, %v603_v53  ;;  %v581_v60 = vld [vmem:[#allocation3 + $0x50] ss:$2 sm:$0xf]  ;;  %v615_v61 = vld [vmem:[#allocation3 + $0x40] ss:$2 sm:$0xf] }
 0x160   : > { %v611_v58 = vmax.f32 %v599_v51, %v607_v54  ;;  %v593_v63 = vld [vmem:[#allocation3 + $0x51] ss:$2 sm:$0xf]  ;;  %v637_v2 = vld [vmem:[#allocation3 + $0x22] ss:$2 sm:$0xf] }
 0x161   : > { %v586_v62 = vmax.f32 %v575_v56, %v581_v60  ;;  %v621_v0 = vmax.f32 %v609_v57, %v615_v61  ;;  %v627_v3 = vld [vmem:[#allocation3 + $0x41] ss:$2 sm:$0xf]  ;;  %v644_v5 = vmax.f32 %v632_v55, %v637_v2  ;;  %v605_v7 = vld [vmem:[#allocation3 + $0x52] ss:$2 sm:$0xf] }
 0x162   : > { %v623_v1 = vmax.f32 %v611_v58, %v619_v59  ;;  %v631_v4 = vld [vmem:[#allocation3 + $0x81] ss:$2 sm:$0xf]  ;;  %v639_v10 = vld [vmem:[#allocation3 + $0x42] ss:$2 sm:$0xf] }
 0x163   : > { %v598_v6 = vmax.f32 %v586_v62, %v593_v63  ;;  %v633_v8 = vmax.f32 %v621_v0, %v627_v3  ;;  %v643_v11 = vld [vmem:[#allocation3 + $0x82] ss:$2 sm:$0xf]  ;;  %649 = vst.msk [vmem:[%s231_s15] sm:$0xf] %vm648_vm5, %v644_v5 }
 0x164   : > { %v635_v9 = vmax.f32 %v623_v1, %v631_v4  ;;  %v617_v15 = vld [vmem:[#allocation3 + $0x60] ss:$2 sm:$0xf]  ;;  %v629_v17 = vld [vmem:[#allocation3 + $0x61] ss:$2 sm:$0xf] }
 0x165   : > { %v610_v12 = vmax.f32 %v598_v6, %v605_v7  ;;  %v645_v13 = vmax.f32 %v633_v8, %v639_v10  ;;  %v641_v19 = vld [vmem:[#allocation3 + $0x62] ss:$2 sm:$0xf] }
 0x166   : > { %v647_v14 = vmax.f32 %v635_v9, %v643_v11 }
 0x167   : > { %v622_v16 = vmax.f32 %v610_v12, %v617_v15  ;;  %650 = vst.msk [vmem:[%s231_s15 + $0x4] sm:$0xf] %vm648_vm5, %v645_v13 }
 0x168   : > { %652 = vst.msk [vmem:[%s231_s15 + $0xc] sm:$0xf] %vm648_vm5, %v647_v14 }
 0x169   : > { %v634_v18 = vmax.f32 %v622_v16, %v629_v17 }
 0x16b   : > { %v646_v20 = vmax.f32 %v634_v18, %v641_v19 }
 0x16d   : > { %651 = vst.msk [vmem:[%s231_s15 + $0x8] sm:$0xf] %vm648_vm5, %v646_v20 }
 0x16e   : > { %1011 = shalt.err (!%p1008_p3)
}
 0x16f   : > { %s1012_s25 = scalar_lea.hbm %s1380_s21, 256  ;;  %s1016_s26 = scalar_lea.hbm %s1438_s3, 2048 }
 0x170   : > { %p1013_p5 = scmp.ne.s32.totalorder %s1380_s21, %s1012_s25  ;;  %p1017_p2 = scmp.lt.u32.totalorder %s1380_s21, %s1438_s3 }
 0x171   : > { %p1018_p4 = scmp.lt.u32.totalorder %s1016_s26, %s1012_s25  ;;  %p1020_p8 = scmp.lt.u32.totalorder %s1012_s25, %s1380_s21 }
 0x172   : > { %p1014_p6 = pnand %p1013_p5, %p1447_p9 }
 0x173   : > { %p1019_p10 = por %p1018_p4, %p1017_p2 }
 0x174   : > { %p1015_p7 = pneg %p1014_p6 }
 0x175   : > { %p1021_p12 = por %p1020_p8, %p1019_p10 }
 0x177   : > { %p1022_p0 = pnand %p1021_p12, %p1015_p7 }
 0x179   : > { %1025 = shalt.err (!%p1022_p0)
}
 0x17a   : > { %s1105_s23 = smov 64   ;;  %s1106_s27 = smov 4  }
 0x17b   : > { %863 = dma.vmem_to_hbm [thread:$0]  (%p1447_p9), %s1375_s9, 256, %s1380_s21, %s654_s24, %s1105_s23, %s1105_s23, %s1106_s27  }
 0x17c PF: > { %p874_p11 = scmp.ge.s32.totalorder %s1096_s19, 2  ;;  %s684_s11 = sand.u32 1, %s1068_s12  }
 0x17d   : > { %p1448_p13 = scmp.ne.s32.totalorder %s1445_s4, 0  ;;  %s685_s30 = scalar_lea.sflag [#allocation6], %s684_s11 }
 0x17f   : > { %p870_p1 = pnand %p874_p11, %p1448_p13 }
 0x181   : > { %1063 = dma.done.wait (!%p870_p1), %s685_s30, 256  }
 0x182   : > { %1065 = vsyncadd (!%p870_p1), %s685_s30, 4294967040  ;;  %s19_s19 = sadd.s32 1, %s1096_s19   ;;  %s1449_s28 = sld [smem:[#allocation10_spill]] }
 0x183   : > { %p16_p3 = scmp.ge.s32.totalorder %s19_s19, 10   ;;  %s1450_s12 = smov %s1072_s13 }
 0x184   : > { %s1451_s13 = smov %s1076_s14  ;;  %s1452_s14 = smov %s1205_s6 }
 0x185   : > { %s1453_s15 = smov %s1088_s17  ;;  %s1454_s16 = smov %s1092_s18 }
 0x186   : > { %s1455_s17 = smov %s1458_s22  ;;  %18 = sbr.rel (!%p16_p3) target bundleno = 7 (0x7), region = 123 }
 0x188   : > { %s1456_s18 = smov %s1449_s28 }
 0x18d   :  { %690 = vsyncpa [#allocation5], 1 }
 0x18e   :  { %692 = vsyncpa [#allocation5 + $0x1], 1 }
 0x18f   :  { %693 = vsyncpa [#allocation6], 1 }
 0x190   :  { %695 = vsyncpa [#allocation6 + $0x1], 1 }

</bundles_post_ra>
